<compile_context>
chip_gen: v7x
topology: tpu7x:2x2x1
jax: 0.10.0
libtpu: 0.0.40
codegen_flags: <defaults>
</compile_context>

<pallas_src>
import jax
import jax.numpy as jnp
from jax.experimental import pallas as pl
from jax.experimental.pallas import tpu as pltpu

LANE = 128  # lane width of a vreg; final-layer weights are padded to this


def _round_up(x, m):
    return (x + m - 1) // m * m


def _mlp_kernel(x_ref, w1_ref, b1_ref, w2_ref, b2_ref, w3_ref, b3_ref, o_ref):
    out_dim = o_ref.shape[-1]

    # Layer 1: Linear(D_in, 128) + ReLU    (Dropout -> identity in eval mode).
    # x arrives as f32 straight from HBM; cast to bf16 in-register so the MXU
    # runs bf16 with f32 accumulation.
    x = x_ref[...].astype(jnp.bfloat16)
    h1 = jnp.dot(x, w1_ref[...], preferred_element_type=jnp.float32)
    h1 = jnp.maximum(h1 + b1_ref[...], 0.0)

    # Layer 2: Linear(128, 64) + ReLU      (Dropout -> identity in eval mode).
    h2 = jnp.dot(h1.astype(jnp.bfloat16), w2_ref[...],
                 preferred_element_type=jnp.float32)
    h2 = jnp.maximum(h2 + b2_ref[...], 0.0)

    # Layer 3: Linear(64, 2).  w3/b3 are zero-padded to 128 lanes (MXU-dense
    # matmul); only the first out_dim columns are written back to HBM.
    out = jnp.dot(h2.astype(jnp.bfloat16), w3_ref[...],
                  preferred_element_type=jnp.float32)
    out = out + b3_ref[...]
    o_ref[...] = out[:, :out_dim].astype(o_ref.dtype)


def multimodal_medical_nn_forward(x, params, *, tile_b=4096):
    """Fused 3-layer MLP forward. x: (B, D_in) float32 -> (B, 2) float32."""
    w1, b1, w2, b2, w3, b3 = params
    B, d_in = x.shape
    out_dim = w3.shape[1]

    # Batch tile: multiple of 8 sublanes, capped at the (8-aligned) batch size.
    b8 = _round_up(B, 8)
    tb = min(_round_up(tile_b, 8), b8)
    # v7x: if the whole batch fits one tile but is splittable, use >= 2 grid
    # steps so both TensorCores get work on the "parallel" batch axis.
    if tb >= b8 and b8 >= 16:
        tb = _round_up(pl.cdiv(b8, 2), 8)
    n_tiles = pl.cdiv(B, tb)  # ragged last tile handled by Pallas block masking

    # Weights cast once to bf16 (tiny, resident in VMEM across grid steps);
    # biases stay f32 for the epilogue.  Final layer padded to 128 lanes.
    w1b = w1.astype(jnp.bfloat16)
    w2b = w2.astype(jnp.bfloat16)
    w3p = jnp.zeros((w3.shape[0], LANE), jnp.bfloat16).at[:, :out_dim].set(
        w3.astype(jnp.bfloat16))
    b3p = jnp.zeros((1, LANE), jnp.float32).at[:, :out_dim].set(
        b3.astype(jnp.float32))
    b1f = b1.astype(jnp.float32)
    b2f = b2.astype(jnp.float32)

    # Weights / biases: same block every grid step -> fetched once, resident.
    def resident(a):
        return pl.BlockSpec(a.shape, lambda i: (0,) * a.ndim)

    flops = 2 * B * (d_in * 128 + 128 * 64 + 64 * LANE)
    bytes_accessed = (B * d_in * 4                       # f32 x stream in
                      + B * out_dim * 4                  # narrow f32 output
                      + (w1b.size + w2b.size + w3p.size) * 2
                      + (b1f.size + b2f.size + b3p.size) * 4)
    cost = pl.CostEstimate(flops=flops, transcendentals=0,
                           bytes_accessed=bytes_accessed)

    return pl.pallas_call(
        _mlp_kernel,
        out_shape=jax.ShapeDtypeStruct((B, out_dim), jnp.float32),
        grid=(n_tiles,),
        in_specs=[
            pl.BlockSpec((tb, d_in), lambda i: (i, 0)),
            resident(w1b), resident(b1f),
            resident(w2b), resident(b2f),
            resident(w3p), resident(b3p),
        ],
        out_specs=pl.BlockSpec((tb, out_dim), lambda i: (i, 0)),
        compiler_params=pltpu.CompilerParams(
            dimension_semantics=("parallel",),   # v7x: shard batch tiles over 2 TCs
            vmem_limit_bytes=32 * 1024 * 1024,   # ample headroom on v5e..v7x
        ),
        cost_estimate=cost,
    )(x.astype(jnp.float32), w1b, b1f, w2b, b2f, w3p, b3p)


def init_params(key, tabular_input_dim):
    """Deterministic init mimicking PyTorch nn.Linear default U(-1/sqrt(fan_in), ...)."""
    dims = [(tabular_input_dim, 128), (128, 64), (64, 2)]
    params = []
    for (fan_in, fan_out) in dims:
        key, kw, kb = jax.random.split(key, 3)
        bound = 1.0 / jnp.sqrt(float(fan_in))
        w = jax.random.uniform(kw, (fan_in, fan_out), jnp.float32, -bound, bound)
        b = jax.random.uniform(kb, (1, fan_out), jnp.float32, -bound, bound)
        params += [w, b]
    return tuple(params)


def reference_forward(x, params):
    w1, b1, w2, b2, w3, b3 = params
    h1 = jnp.maximum(x @ w1 + b1, 0.0)
    h2 = jnp.maximum(h1 @ w2 + b2, 0.0)
    return h2 @ w3 + b3


if __name__ == "__main__":
    key = jax.random.PRNGKey(0)
    k_in, k_par = jax.random.split(key)

    batch = 8
    tabular_input_dim = 32   # small synthetic tabular feature dim

    x = jax.random.normal(k_in, (batch, tabular_input_dim), dtype=jnp.float32)
    params = init_params(k_par, tabular_input_dim)

    out = multimodal_medical_nn_forward(x, params)
    out = jax.block_until_ready(out)

    ref = reference_forward(x, params)
    assert out.shape == (batch, 2), out.shape
    # bf16 MXU operands -> relaxed tolerance vs the f32 reference.
    assert jnp.allclose(out, ref, atol=5e-2, rtol=5e-2), (
        "mismatch vs JAX reference: max abs diff "
        f"{float(jnp.max(jnp.abs(out - ref)))}")

    print("KERNEL_OK")
</pallas_src>

<mosaic_0001>
module attributes {stable_mosaic.version = 11 : i64} {
  func.func @_mlp_kernel(%arg0: i32, %arg1: memref<8x32xf32, #tpu.memory_space<vmem>>, %arg2: memref<32x128xbf16, #tpu.memory_space<vmem>>, %arg3: memref<1x128xf32, #tpu.memory_space<vmem>>, %arg4: memref<128x64xbf16, #tpu.memory_space<vmem>>, %arg5: memref<1x64xf32, #tpu.memory_space<vmem>>, %arg6: memref<64x128xbf16, #tpu.memory_space<vmem>>, %arg7: memref<1x128xf32, #tpu.memory_space<vmem>>, %arg8: memref<8x2xf32, #tpu.memory_space<vmem>>) attributes {dimension_semantics = [#tpu.dimension_semantics<parallel>], iteration_bounds = array<i64: 1>, scalar_prefetch = 0 : i64, scratch_operands = 0 : i64, tpu.core_type = #tpu.core_type<tc>, window_params = [{transform_indices = @transform_0, window_bounds = array<i64: 8, 32>}, {pipeline_mode = #tpu.pipeline_mode<synchronous>, transform_indices = @transform_1, window_bounds = array<i64: 32, 128>}, {pipeline_mode = #tpu.pipeline_mode<synchronous>, transform_indices = @transform_2, window_bounds = array<i64: 1, 128>}, {pipeline_mode = #tpu.pipeline_mode<synchronous>, transform_indices = @transform_3, window_bounds = array<i64: 128, 64>}, {pipeline_mode = #tpu.pipeline_mode<synchronous>, transform_indices = @transform_4, window_bounds = array<i64: 1, 64>}, {pipeline_mode = #tpu.pipeline_mode<synchronous>, transform_indices = @transform_5, window_bounds = array<i64: 64, 128>}, {pipeline_mode = #tpu.pipeline_mode<synchronous>, transform_indices = @transform_6, window_bounds = array<i64: 1, 128>}, {transform_indices = @transform_7, window_bounds = array<i64: 8, 2>}]} {
    %c0 = arith.constant 0 : index
    %c0_0 = arith.constant 0 : index
    %0 = vector.load %arg1[%c0, %c0_0] : memref<8x32xf32, #tpu.memory_space<vmem>>, vector<8x32xf32>
    %1 = arith.truncf %0 : vector<8x32xf32> to vector<8x32xbf16>
    %c0_1 = arith.constant 0 : index
    %c0_2 = arith.constant 0 : index
    %2 = vector.load %arg2[%c0_1, %c0_2] : memref<32x128xbf16, #tpu.memory_space<vmem>>, vector<32x128xbf16>
    %cst = arith.constant dense<0.000000e+00> : vector<8x128xf32>
    %3 = tpu.matmul %1, %2, %cst {dimension_numbers = #tpu.dot_dimension_numbers<[1], [0], [0], [1], [0, 0, 1, 1], [], []>} : vector<8x32xbf16>, vector<32x128xbf16>, vector<8x128xf32> -> vector<8x128xf32>
    %c0_3 = arith.constant 0 : index
    %c0_4 = arith.constant 0 : index
    %4 = vector.load %arg3[%c0_3, %c0_4] : memref<1x128xf32, #tpu.memory_space<vmem>>, vector<1x128xf32>
    %5 = vector.broadcast %4 : vector<1x128xf32> to vector<8x128xf32>
    %6 = arith.addf %3, %5 : vector<8x128xf32>
    %cst_5 = arith.constant 0.000000e+00 : f32
    %7 = vector.broadcast %cst_5 : f32 to vector<8x128xf32>
    %8 = arith.maximumf %6, %7 : vector<8x128xf32>
    %9 = arith.truncf %8 : vector<8x128xf32> to vector<8x128xbf16>
    %c0_6 = arith.constant 0 : index
    %c0_7 = arith.constant 0 : index
    %10 = vector.load %arg4[%c0_6, %c0_7] : memref<128x64xbf16, #tpu.memory_space<vmem>>, vector<128x64xbf16>
    %cst_8 = arith.constant dense<0.000000e+00> : vector<8x64xf32>
    %11 = tpu.matmul %9, %10, %cst_8 {dimension_numbers = #tpu.dot_dimension_numbers<[1], [0], [0], [1], [0, 0, 1, 1], [], []>} : vector<8x128xbf16>, vector<128x64xbf16>, vector<8x64xf32> -> vector<8x64xf32>
    %c0_9 = arith.constant 0 : index
    %c0_10 = arith.constant 0 : index
    %12 = vector.load %arg5[%c0_9, %c0_10] : memref<1x64xf32, #tpu.memory_space<vmem>>, vector<1x64xf32>
    %13 = vector.broadcast %12 : vector<1x64xf32> to vector<8x64xf32>
    %14 = arith.addf %11, %13 : vector<8x64xf32>
    %cst_11 = arith.constant 0.000000e+00 : f32
    %15 = vector.broadcast %cst_11 : f32 to vector<8x64xf32>
    %16 = arith.maximumf %14, %15 : vector<8x64xf32>
    %17 = arith.truncf %16 : vector<8x64xf32> to vector<8x64xbf16>
    %c0_12 = arith.constant 0 : index
    %c0_13 = arith.constant 0 : index
    %18 = vector.load %arg6[%c0_12, %c0_13] : memref<64x128xbf16, #tpu.memory_space<vmem>>, vector<64x128xbf16>
    %cst_14 = arith.constant dense<0.000000e+00> : vector<8x128xf32>
    %19 = tpu.matmul %17, %18, %cst_14 {dimension_numbers = #tpu.dot_dimension_numbers<[1], [0], [0], [1], [0, 0, 1, 1], [], []>} : vector<8x64xbf16>, vector<64x128xbf16>, vector<8x128xf32> -> vector<8x128xf32>
    %c0_15 = arith.constant 0 : index
    %c0_16 = arith.constant 0 : index
    %20 = vector.load %arg7[%c0_15, %c0_16] : memref<1x128xf32, #tpu.memory_space<vmem>>, vector<1x128xf32>
    %21 = vector.broadcast %20 : vector<1x128xf32> to vector<8x128xf32>
    %22 = arith.addf %19, %21 : vector<8x128xf32>
    %23 = vector.extract_strided_slice %22 {offsets = [0, 0], sizes = [8, 2], strides = [1, 1]} : vector<8x128xf32> to vector<8x2xf32>
    %c0_17 = arith.constant 0 : index
    %c0_18 = arith.constant 0 : index
    %24 = vector.load %arg8[%c0_17, %c0_18] : memref<8x2xf32, #tpu.memory_space<vmem>>, vector<8x2xf32>
    tpu.vector_store %arg8[%c0_17, %c0_18], %23 {strides = array<i32>} : memref<8x2xf32, #tpu.memory_space<vmem>>, vector<8x2xf32>,
    return
  }
  func.func @transform_0(%arg0: i32) -> (i32, i32) {
    %c0_i32 = arith.constant 0 : i32
    %c0_i32_0 = arith.constant 0 : i32
    return %arg0, %c0_i32 : i32, i32
  }
  func.func @transform_1(%arg0: i32) -> (i32, i32) {
    %c0_i32 = arith.constant 0 : i32
    %c0_i32_0 = arith.constant 0 : i32
    %c0_i32_1 = arith.constant 0 : i32
    return %c0_i32, %c0_i32_0 : i32, i32
  }
  func.func @transform_2(%arg0: i32) -> (i32, i32) {
    %c0_i32 = arith.constant 0 : i32
    %c0_i32_0 = arith.constant 0 : i32
    %c0_i32_1 = arith.constant 0 : i32
    return %c0_i32, %c0_i32_0 : i32, i32
  }
  func.func @transform_3(%arg0: i32) -> (i32, i32) {
    %c0_i32 = arith.constant 0 : i32
    %c0_i32_0 = arith.constant 0 : i32
    %c0_i32_1 = arith.constant 0 : i32
    return %c0_i32, %c0_i32_0 : i32, i32
  }
  func.func @transform_4(%arg0: i32) -> (i32, i32) {
    %c0_i32 = arith.constant 0 : i32
    %c0_i32_0 = arith.constant 0 : i32
    %c0_i32_1 = arith.constant 0 : i32
    return %c0_i32, %c0_i32_0 : i32, i32
  }
  func.func @transform_5(%arg0: i32) -> (i32, i32) {
    %c0_i32 = arith.constant 0 : i32
    %c0_i32_0 = arith.constant 0 : i32
    %c0_i32_1 = arith.constant 0 : i32
    return %c0_i32, %c0_i32_0 : i32, i32
  }
  func.func @transform_6(%arg0: i32) -> (i32, i32) {
    %c0_i32 = arith.constant 0 : i32
    %c0_i32_0 = arith.constant 0 : i32
    %c0_i32_1 = arith.constant 0 : i32
    return %c0_i32, %c0_i32_0 : i32, i32
  }
  func.func @transform_7(%arg0: i32) -> (i32, i32) {
    %c0_i32 = arith.constant 0 : i32
    %c0_i32_0 = arith.constant 0 : i32
    return %arg0, %c0_i32 : i32, i32
  }
}

</mosaic_0001>

<bundles_post_ra>
// kernel: tpu_custom_call.1
= control target key start
LH: loop header
LB: loop body
LE: loop exit
PB: predicated region body
PF: predicated region fallthrough
CT: control target
= control target key end

     0   :  { %v392_v0 = vmov 0.0   ;;  %vm393_vm0 = vmmov 0   ;;  %vm52_vm1 = vcmask 261120   ;;  %vm250_vm2 = vcmask 523264   ;;  %s494_s1 = inlined_call_operand.vmem [shape: bf16[32,128], index: 1, kind: input, shape index: {}]   ;;  %s495_s0 = inlined_call_operand.vmem [shape: f32[8,32], index: 0, kind: input, shape index: {}]   ;;  %s496_s3 = inlined_call_operand.vmem [shape: bf16[128,64], index: 3, kind: input, shape index: {}]   ;;  %s497_s5 = inlined_call_operand.vmem [shape: bf16[64,128], index: 5, kind: input, shape index: {}]   ;;  %s498_s2 = inlined_call_operand.vmem [shape: f32[1,128], index: 2, kind: input, shape index: {}]   ;;  %s499_s4 = inlined_call_operand.vmem [shape: f32[1,64], index: 4, kind: input, shape index: {}]   ;;  %s500_s6 = inlined_call_operand.vmem [shape: f32[1,128], index: 6, kind: input, shape index: {}]   ;;  %s501_s7 = inlined_call_operand.vmem [shape: f32[8,2], index: 7, kind: output, shape index: {}]  }
   0x1   :  { %336 = vmatprep.subr.bf16.mxu0 %v392_v0  ;;  %v378_v1 = vld [vmem:[%s494_s1] sm:$0xff]   ;;  %340 = vmatprep.mubr.msk.bf16.mxu0 %vm393_vm0, %v392_v0  ;;  %v379_v2 = vld [vmem:[%s494_s1 + $0x8] sm:$0xff]   ;;  %v382_v7 = vld [vmem:[%s496_s3 + $0x10] sm:$0xff]   ;;  %vm294_vm3 = vcmask 15360  }
   0x2   :  { %344 = vmatprep.subr.bf16.mxu1 %v392_v0  ;;  %360 = vmatprep.mubr.msk.bf16.mxu1 %vm393_vm0, %v392_v0  ;;  %v27_v3 = vld [vmem:[%s495_s0] sm:$0xff]  ;;  %v381_v6 = vld [vmem:[%s496_s3 + $0x8] sm:$0xff]   ;;  %v383_v8 = vld [vmem:[%s496_s3 + $0x18] sm:$0xff]  }
   0x3   :  { %337 = vmatpush3.bf16.msra.mxu0 %v378_v1  ;;  %v380_v4 = vld [vmem:[%s496_s3] sm:$0xff]   ;;  %v28_v5 = vpack.c.bf16 %v27_v3, %v27_v3  ;;  %v385_v10 = vld [vmem:[%s496_s3 + $0x28] sm:$0xff]   ;;  %v386_v11 = vld [vmem:[%s496_s3 + $0x30] sm:$0xff]  }
   0x4   :  { %338 = vmatprep.subr.bf16.mxu0 %v392_v0  ;;  %345 = vmatpush3.bf16.msra.mxu1 %v380_v4  ;;  %v384_v9 = vld [vmem:[%s496_s3 + $0x20] sm:$0xff]   ;;  %v387_v12 = vld [vmem:[%s496_s3 + $0x38] sm:$0xff]   ;;  %v389_v14 = vld [vmem:[%s497_s5 + $0x8] sm:$0xff]  }
   0x5   :  { %346 = vmatprep.subr.bf16.mxu1 %v392_v0  ;;  %v388_v13 = vld [vmem:[%s497_s5] sm:$0xff]   ;;  %v390_v23 = vld [vmem:[%s497_s5 + $0x10] sm:$0xff]   ;;  %v391_v24 = vld [vmem:[%s497_s5 + $0x18] sm:$0xff]  }
   0x6   :  { %v300_v15 = vld [vmem:[%s498_s2] ss:$0 sm:$0xff] }
   0x7   :  { %339 = vmatpush3.bf16.msra.mxu0 %v379_v2  ;;  %v304_v25 = vld [vmem:[%s499_s4] ss:$0 sm:$0xff] }
   0x8   :  { %364 = vmatprep.subr.bf16.mxu0 %v392_v0  ;;  %347 = vmatpush3.bf16.msra.mxu1 %v381_v6  ;;  %v313_v33 = vld [vmem:[%s500_s6] ss:$0 sm:$0xff] }
   0x9   :  { %348 = vmatprep.subr.bf16.mxu1 %v392_v0 }
   0xa   :  { %341 = vmatmul.mubr.msk.bf16.vlgmr.msra.gmra.mrb[0].mxu0 %vm52_vm1, %v28_v5 }
   0xb   :  { %372 = vmatprep.mubr.msk.bf16.mxu0 %vm393_vm0, %v392_v0  ;;  %365 = vmatpush3.bf16.msra.mxu0 %v388_v13 }
   0xc   :  { %349 = vmatpush3.bf16.msra.mxu1 %v382_v7  ;;  %366 = vmatprep.subr.bf16.mxu0 %v392_v0 }
   0xd   :  { %350 = vmatprep.subr.bf16.mxu1 %v392_v0 }
   0xf   :  { %367 = vmatpush3.bf16.msra.mxu0 %v389_v14 }
  0x10   :  { %351 = vmatpush3.bf16.msra.mxu1 %v383_v8  ;;  %368 = vmatprep.subr.bf16.mxu0 %v392_v0 }
  0x11   :  { %352 = vmatprep.subr.bf16.mxu1 %v392_v0 }
  0x13   :  { %369 = vmatpush3.bf16.msra.mxu0 %v390_v23 }
  0x14   :  { %353 = vmatpush3.bf16.msra.mxu1 %v384_v9  ;;  %370 = vmatprep.subr.bf16.mxu0 %v392_v0 }
  0x15   :  { %354 = vmatprep.subr.bf16.mxu1 %v392_v0 }
  0x17   :  { %371 = vmatpush3.bf16.msra.mxu0 %v391_v24 }
  0x18   :  { %355 = vmatpush3.bf16.msra.mxu1 %v385_v10 }
  0x19   :  { %356 = vmatprep.subr.bf16.mxu1 %v392_v0 }
  0x1c   :  { %357 = vmatpush3.bf16.msra.mxu1 %v386_v11 }
  0x1d   :  { %358 = vmatprep.subr.bf16.mxu1 %v392_v0 }
  0x20   :  { %359 = vmatpush3.bf16.msra.mxu1 %v387_v12 }
  0xdd   :  { %v90_v16 = vpop.f32.mrb[0].mxu0 }
  0xde   :  { %v91_v17 = vadd.f32 %v300_v15, %v90_v16  ;;  %v342_v18 = vpop.f32.mrb[1].mxu0 }
  0xdf   :  { %v93_v19 = vpop.f32.mrb[2].mxu0 }
  0xe0   :  { %v96_v20 = vmax.f32 %v91_v17, 0.0  ;;  %v343_v21 = vpop.f32.mrb[3].mxu0 }
  0xe2   :  { %v97_v22 = vpack.c.bf16 %v96_v20, %v96_v20 }
  0xe4   :  { %361 = vmatmul.mubr.bf16.vlgmr.msra.gmra.mrb[0].mxu1 %v97_v22 }
 0x1b7   :  { %v203_v26 = vpop.f32.mrb[0].mxu1 }
 0x1b8   :  { %v204_v27 = vadd.f32 %v304_v25, %v203_v26  ;;  %v362_v28 = vpop.f32.mrb[1].mxu1 }
 0x1b9   :  { %v206_v29 = vpop.f32.mrb[2].mxu1 }
 0x1ba   :  { %v209_v30 = vmax.f32 %v204_v27, 0.0  ;;  %v363_v31 = vpop.f32.mrb[3].mxu1 }
 0x1bc   :  { %v210_v32 = vpack.c.bf16 %v209_v30, %v209_v30 }
 0x1be   :  { %373 = vmatmul.mubr.msk.bf16.vlgmr.msra.gmra.mrb[4].mxu0 %vm250_vm2, %v210_v32 }
 0x291   :  { %v288_v34 = vpop.f32.mrb[4].mxu0 }
 0x292   :  { %v289_v35 = vadd.f32 %v313_v33, %v288_v34  ;;  %v374_v36 = vpop.f32.mrb[5].mxu0 }
 0x293   :  { %v291_v37 = vpop.f32.mrb[6].mxu0 }
 0x294   :  { %295 = vst.msk [vmem:[%s501_s7] sm:$0xff] %vm294_vm3, %v289_v35  ;;  %v375_v38 = vpop.f32.mrb[7].mxu0 }

</bundles_post_ra>
